<compile_context>
chip_gen: v5e
topology: v5e:2x2
jax: 0.10.0
libtpu: 0.0.40
codegen_flags: <defaults>
</compile_context>

<pallas_src>
import functools

import jax
import jax.numpy as jnp
from jax.experimental import pallas as pl
from jax.experimental.pallas import tpu as pltpu


# Only split the HW axis for extra (megacore) parallelism when each resulting
# block still holds at least this many f32 elements (~1 MiB): below that the
# per-step pipeline overhead / shorter DMA bursts outweigh the 2nd-TC win.
_MIN_SPLIT_BLOCK_ELEMS = 256 * 1024


@functools.lru_cache(maxsize=1)
def _budgets():
    """(vmem_limit_bytes, max_block_elems) gated on the chip generation.

    v5e/v6e have 128 MiB physical VMEM -> large blocks amortize the ~0.35us
    per-grid-step overhead; v7x has only 64 MiB per TensorCore (the norm
    kernel needs ~4x block for its double-buffered in+out streams), so keep
    conservative tiling there and for unknown chips.
    """
    vmem_cap = None
    try:
        vmem_cap = getattr(pltpu.get_tpu_info(), "vmem_capacity_bytes", None)
    except Exception:
        vmem_cap = None
    if vmem_cap is not None and vmem_cap >= 100 * 1024 * 1024:
        return 64 * 1024 * 1024, 2 * 1024 * 1024       # 8 MiB f32 blocks
    return 32 * 1024 * 1024, 768 * 1024                # 3 MiB f32 blocks


def _pick_channel_tile(C, HW, max_block_elems):
    """Largest channel tile dividing C, sublane-aligned (multiple of 8 or the
    full C), whose (tc, HW) block fits the budget.  If nothing fits, return the
    smallest aligned tile and rely on HW tiling below to shrink the block."""
    if C * HW <= max_block_elems:
        return C
    best = None
    tc = 8
    while tc <= C:
        if C % tc == 0 and tc * HW <= max_block_elems:
            best = tc
        tc += 8
    if best is not None:
        return best
    return 8 if C % 8 == 0 else C


def _pick_hw_tile(HW, tc, max_block_elems, want_split):
    """Largest thw with HW % thw == 0 and (thw % 128 == 0 or thw == HW) such
    that a (tc, thw) block fits the budget; prefers >= 2 tiles if want_split."""
    if tc * HW <= max_block_elems and not want_split:
        return HW
    cands = [d for d in range(128, HW, 128) if HW % d == 0]
    for d in sorted(cands, reverse=True):
        if tc * d <= max_block_elems:
            return d
    # No lane-aligned proper divisor of HW fits: fall back to the full extent.
    # Only reachable for small / oddly shaped HW (7x7, 14x14, ...) where the
    # full block is cheap anyway.
    return HW


# ----------------------------------------------------------------------------
# Kernel 1: single-pass weighted per-(channel, hw-tile) moments.
# ----------------------------------------------------------------------------
def _stats_kernel(x_ref, w_ref, off_ref, s1_ref, s2_ref):
    n = pl.program_id(2)                         # sample index (reduction axis)
    x = x_ref[...].astype(jnp.float32)           # (tc, thw)
    w = w_ref[n]                                 # scalar weight from SMEM

    @pl.when(n == 0)
    def _():
        # numerical offset: per-channel mean of the first sample's block
        off_ref[...] = jnp.mean(x, axis=1, keepdims=True)
        s1_ref[...] = jnp.zeros_like(s1_ref)
        s2_ref[...] = jnp.zeros_like(s2_ref)

    xc = x - off_ref[...]
    s1_ref[...] += w * jnp.sum(xc, axis=1, keepdims=True)
    s2_ref[...] += w * jnp.sum(xc * xc, axis=1, keepdims=True)


def _weighted_stats(x3, w):
    """x3: (N, C, HW), w: (N,) f32 -> per-channel (mean, var_), each (C,)."""
    N, C, HW = x3.shape
    vmem_limit, max_block_elems = _budgets()
    tc = _pick_channel_tile(C, HW, max_block_elems)
    c_tiles = C // tc
    # When c_tiles == 1 the channel axis alone offers no megacore parallelism;
    # split HW (lane-aligned divisor) so both v7x TensorCores stream the pass.
    want_split = (c_tiles < 2) and (tc * HW >= 2 * _MIN_SPLIT_BLOCK_ELEMS)
    thw = _pick_hw_tile(HW, tc, max_block_elems, want_split)
    hw_tiles = HW // thw

    off, s1, s2 = pl.pallas_call(
        _stats_kernel,
        out_shape=(jax.ShapeDtypeStruct((hw_tiles, C, 1), jnp.float32),
                   jax.ShapeDtypeStruct((hw_tiles, C, 1), jnp.float32),
                   jax.ShapeDtypeStruct((hw_tiles, C, 1), jnp.float32)),
        grid=(c_tiles, hw_tiles, N),
        in_specs=[pl.BlockSpec((None, tc, thw), lambda c, h, n: (n, c, h)),
                  pl.BlockSpec(memory_space=pltpu.MemorySpace.SMEM)],
        out_specs=(pl.BlockSpec((None, tc, 1), lambda c, h, n: (h, c, 0)),
                   pl.BlockSpec((None, tc, 1), lambda c, h, n: (h, c, 0)),
                   pl.BlockSpec((None, tc, 1), lambda c, h, n: (h, c, 0))),
        compiler_params=pltpu.CompilerParams(
            dimension_semantics=("parallel", "parallel", "arbitrary"),
            vmem_limit_bytes=vmem_limit),
    )(x3, w)

    # Finalize (tiny O(C*hw_tiles) glue): per-tile weighted moments combined
    # with Chan's parallel formula, matching the torch semantics:
    #   mean = sum(w*x) / (H*W * w.sum())
    #   var_ = sum(w*(x-mean)^2) / (H*W * w.sum())
    wsum = jnp.sum(w)
    cnt = thw * wsum                           # weighted element count / tile
    off = off[:, :, 0]                         # (T, C)
    s1 = s1[:, :, 0]
    s2 = s2[:, :, 0]
    mean_t = off + s1 / cnt                    # per-tile weighted means
    m2_t = s2 - (s1 * s1) / cnt                # per-tile weighted SSE about mean_t
    mean = jnp.mean(mean_t, axis=0)            # equal-sized tiles -> plain average
    m2 = jnp.sum(m2_t + cnt * (mean_t - mean[None, :]) ** 2, axis=0)
    var_ = jnp.maximum(m2 / (HW * wsum), 0.0)  # clamp rounding-induced negatives
    return mean, var_


# ----------------------------------------------------------------------------
# Kernel 2: elementwise normalization as a single FMA per element.
# ----------------------------------------------------------------------------
def _norm_kernel(x_ref, scale_ref, shift_ref, o_ref):
    o_ref[...] = (x_ref[...] * scale_ref[...] + shift_ref[...]).astype(o_ref.dtype)


def _apply_norm(x3, scale_c1, shift_c1):
    N, C, HW = x3.shape
    vmem_limit, max_block_elems = _budgets()
    tc = _pick_channel_tile(C, HW, max_block_elems)
    c_tiles = C // tc
    # Split HW when there is otherwise nothing to shard across v7x's two TCs
    # (e.g. N == 1 inference with c_tiles == 1) and the blocks are large.
    want_split = (c_tiles * N < 2) and (tc * HW >= 2 * _MIN_SPLIT_BLOCK_ELEMS)
    thw = _pick_hw_tile(HW, tc, max_block_elems, want_split)
    hw_tiles = HW // thw

    # Channel tile is the OUTER grid axis so the (tc, 1) scale/shift blocks
    # keep a constant block index across the inner (N, hw) loop -> resident,
    # no repeated per-step DMAs for them.
    return pl.pallas_call(
        _norm_kernel,
        out_shape=jax.ShapeDtypeStruct((N, C, HW), x3.dtype),
        grid=(c_tiles, N, hw_tiles),
        in_specs=[pl.BlockSpec((None, tc, thw), lambda c, n, h: (n, c, h)),
                  pl.BlockSpec((tc, 1), lambda c, n, h: (c, 0)),
                  pl.BlockSpec((tc, 1), lambda c, n, h: (c, 0))],
        out_specs=pl.BlockSpec((None, tc, thw), lambda c, n, h: (n, c, h)),
        compiler_params=pltpu.CompilerParams(
            dimension_semantics=("parallel", "parallel", "parallel"),
            vmem_limit_bytes=vmem_limit),
    )(x3, scale_c1, shift_c1)


def batch_weight_norm2d(x, w, gamma, beta, running_mean, running_var,
                        eps=1e-5, momentum=0.1, training=True,
                        update_batch_stats=True):
    """Forward of _BatchWeightNorm2d.

    x: (N, C, H, W), w: (N,) per-sample weights.
    Returns (out (N,C,H,W), new_running_mean (C,), new_running_var (C,)).
    """
    N, C, H, W = x.shape
    HW = H * W
    x3 = x.reshape(N, C, HW)                     # free reshape, no transpose
    w32 = w.astype(jnp.float32)
    g = gamma.astype(jnp.float32).reshape(C)
    b = beta.astype(jnp.float32).reshape(C)

    if training:
        mean, var_ = _weighted_stats(x3, w32)
        # running-stat bookkeeping, matches get_var2d:
        #   scale = N*H*W*w.sum()/N ; running_temp_var = var * scale/(scale-1)
        # (the maximum() only guards the degenerate scale <= 1 case).
        eff = HW * jnp.sum(w32)
        running_temp_var = var_ * eff / jnp.maximum(eff - 1.0, 1e-12)
        if update_batch_stats:
            new_rm = running_mean * (1.0 - momentum) + mean * momentum
            new_rv = running_var * (1.0 - momentum) + running_temp_var * momentum
        else:
            new_rm, new_rv = running_mean, running_var
    else:
        mean = running_mean.astype(jnp.float32).reshape(C)
        var_ = running_var.astype(jnp.float32).reshape(C)
        new_rm, new_rv = running_mean, running_var

    # hoisted per-channel scale/shift (O(C) glue; kernel body is one FMA/elem)
    scale = g * jax.lax.rsqrt(var_ + eps)
    shift = b - mean * scale
    out3 = _apply_norm(x3, scale.reshape(C, 1), shift.reshape(C, 1))
    return out3.reshape(N, C, H, W), new_rm, new_rv


# ----------------------------------------------------------------------------
# Pure-JAX reference of the PyTorch forward (training branch), for checking.
# ----------------------------------------------------------------------------
def _reference(x, w, gamma, beta, eps):
    N, C, H, W = x.shape
    w_exd = w.reshape(N, 1, 1, 1)
    mean = (w_exd * x).mean(axis=(0, 2, 3)) * N / w.sum()
    m = mean.reshape(1, C, 1, 1)
    var_ = ((x - m) ** 2 * w_exd).mean(axis=(0, 2, 3)) * N / w.sum()
    v = var_.reshape(1, C, 1, 1)
    return (gamma.reshape(1, C, 1, 1) * (x - m) / jnp.sqrt(v + eps)
            + beta.reshape(1, C, 1, 1)), mean, var_


if __name__ == "__main__":
    N, C, H, W = 2, 4, 16, 16
    eps, momentum = 1e-5, 0.1

    key = jax.random.PRNGKey(0)
    kx, kw = jax.random.split(key)
    x = jax.random.normal(kx, (N, C, H, W), dtype=jnp.float32)
    w = jax.random.uniform(kw, (N,), dtype=jnp.float32, minval=0.5, maxval=1.5)

    # Deterministic parameter init, matching reset_parameters():
    gamma = jnp.ones((C,), jnp.float32)          # weight = 1
    beta = jnp.zeros((C,), jnp.float32)          # bias = 0
    running_mean = jnp.zeros((C,), jnp.float32)
    running_var = jnp.ones((C,), jnp.float32)

    out, new_rm, new_rv = batch_weight_norm2d(
        x, w, gamma, beta, running_mean, running_var,
        eps=eps, momentum=momentum, training=True, update_batch_stats=True)
    jax.block_until_ready((out, new_rm, new_rv))

    ref_out, ref_mean, ref_var = _reference(x, w, gamma, beta, eps)
    assert out.shape == (N, C, H, W)
    assert jnp.max(jnp.abs(out - ref_out)) < 1e-3

    # verify running-stat bookkeeping against the PyTorch formulas
    sc = H * W * jnp.sum(w)
    ref_rm = running_mean * (1.0 - momentum) + ref_mean * momentum
    ref_rv = running_var * (1.0 - momentum) + (ref_var * sc / (sc - 1.0)) * momentum
    assert jnp.max(jnp.abs(new_rm - ref_rm)) < 1e-3
    assert jnp.max(jnp.abs(new_rv - ref_rv)) < 1e-3

    # Force the HW-tiled (hw_tiles > 1) path at this small shape and re-check
    # the Chan per-tile combine and the hw-parallel grids.
    _MIN_SPLIT_BLOCK_ELEMS = 64
    out_sp, rm_sp, rv_sp = batch_weight_norm2d(
        x, w, gamma, beta, running_mean, running_var,
        eps=eps, momentum=momentum, training=True, update_batch_stats=True)
    jax.block_until_ready((out_sp, rm_sp, rv_sp))
    assert jnp.max(jnp.abs(out_sp - ref_out)) < 1e-3
    assert jnp.max(jnp.abs(rm_sp - ref_rm)) < 1e-3
    assert jnp.max(jnp.abs(rv_sp - ref_rv)) < 1e-3

    # eval mode with N=1 (uses running stats; exercises the hw-split norm grid)
    x1 = x[:1]
    out_eval, _, _ = batch_weight_norm2d(
        x1, w[:1], gamma, beta, new_rm, new_rv,
        eps=eps, momentum=momentum, training=False)
    jax.block_until_ready(out_eval)
    ref_eval = (gamma.reshape(1, C, 1, 1)
                * (x1 - new_rm.reshape(1, C, 1, 1))
                / jnp.sqrt(new_rv.reshape(1, C, 1, 1) + eps)
                + beta.reshape(1, C, 1, 1))
    assert jnp.max(jnp.abs(out_eval - ref_eval)) < 1e-3
    _MIN_SPLIT_BLOCK_ELEMS = 256 * 1024

    print("KERNEL_OK")
</pallas_src>

<mosaic_0001>
module attributes {stable_mosaic.version = 11 : i64} {
  func.func @_stats_kernel(%arg0: i32, %arg1: i32, %arg2: i32, %arg3: memref<1x4x256xf32, #tpu.memory_space<vmem>>, %arg4: memref<2xf32, #tpu.memory_space<smem>>, %arg5: memref<1x4x1xf32, #tpu.memory_space<vmem>>, %arg6: memref<1x4x1xf32, #tpu.memory_space<vmem>>, %arg7: memref<1x4x1xf32, #tpu.memory_space<vmem>>) attributes {dimension_semantics = [#tpu.dimension_semantics<parallel>, #tpu.dimension_semantics<parallel>, #tpu.dimension_semantics<arbitrary>], iteration_bounds = array<i64: 1, 1, 2>, scalar_prefetch = 0 : i64, scratch_operands = 0 : i64, tpu.core_type = #tpu.core_type<tc>, window_params = [{transform_indices = @transform_0, window_bounds = array<i64: 1, 4, 256>}, {transform_indices = @transform_1, window_bounds = array<i64: 2>}, {transform_indices = @transform_2, window_bounds = array<i64: 1, 4, 1>}, {transform_indices = @transform_3, window_bounds = array<i64: 1, 4, 1>}, {transform_indices = @transform_4, window_bounds = array<i64: 1, 4, 1>}]} {
    %c0 = arith.constant 0 : index
    %c0_0 = arith.constant 0 : index
    %c0_1 = arith.constant 0 : index
    %0 = vector.load %arg3[%c0, %c0_0, %c0_1] : memref<1x4x256xf32, #tpu.memory_space<vmem>>, vector<1x4x256xf32>
    %1 = vector.shape_cast %0 : vector<1x4x256xf32> to vector<4x256xf32>
    %2 = arith.index_cast %arg2 : i32 to index
    %3 = memref.load %arg4[%2] : memref<2xf32, #tpu.memory_space<smem>>
    %c0_i32 = arith.constant 0 : i32
    %4 = arith.cmpi eq, %arg2, %c0_i32 : i32
    %5 = arith.extui %4 : i1 to i32
    %c0_i32_2 = arith.constant 0 : i32
    %6 = arith.cmpi ne, %5, %c0_i32_2 : i32
    scf.if %6 {
      %cst_19 = arith.constant dense<0.000000e+00> : vector<4xf32>
      %32 = vector.multi_reduction <add>, %1, %cst_19 [1] : vector<4x256xf32> to vector<4xf32>
      %33 = vector.shape_cast %32 : vector<4xf32> to vector<4x1xf32>
      %cst_20 = arith.constant 2.560000e+02 : f32
      %34 = vector.broadcast %cst_20 : f32 to vector<4x1xf32>
      %35 = arith.divf %33, %34 : vector<4x1xf32>
      %c0_21 = arith.constant 0 : index
      %c0_22 = arith.constant 0 : index
      %c0_23 = arith.constant 0 : index
      %36 = vector.load %arg5[%c0_21, %c0_22, %c0_23] : memref<1x4x1xf32, #tpu.memory_space<vmem>>, vector<1x4x1xf32>
      %37 = vector.shape_cast %36 : vector<1x4x1xf32> to vector<4x1xf32>
      %38 = vector.shape_cast %35 : vector<4x1xf32> to vector<1x4x1xf32>
      tpu.vector_store %arg5[%c0_21, %c0_22, %c0_23], %38 {strides = array<i32>} : memref<1x4x1xf32, #tpu.memory_space<vmem>>, vector<1x4x1xf32>,
      %cst_24 = arith.constant 0.000000e+00 : f32
      %39 = vector.broadcast %cst_24 : f32 to vector<4x1xf32>
      %c0_25 = arith.constant 0 : index
      %c0_26 = arith.constant 0 : index
      %c0_27 = arith.constant 0 : index
      %40 = vector.load %arg6[%c0_25, %c0_26, %c0_27] : memref<1x4x1xf32, #tpu.memory_space<vmem>>, vector<1x4x1xf32>
      %41 = vector.shape_cast %40 : vector<1x4x1xf32> to vector<4x1xf32>
      %42 = vector.shape_cast %39 : vector<4x1xf32> to vector<1x4x1xf32>
      tpu.vector_store %arg6[%c0_25, %c0_26, %c0_27], %42 {strides = array<i32>} : memref<1x4x1xf32, #tpu.memory_space<vmem>>, vector<1x4x1xf32>,
      %cst_28 = arith.constant 0.000000e+00 : f32
      %43 = vector.broadcast %cst_28 : f32 to vector<4x1xf32>
      %c0_29 = arith.constant 0 : index
      %c0_30 = arith.constant 0 : index
      %c0_31 = arith.constant 0 : index
      %44 = vector.load %arg7[%c0_29, %c0_30, %c0_31] : memref<1x4x1xf32, #tpu.memory_space<vmem>>, vector<1x4x1xf32>
      %45 = vector.shape_cast %44 : vector<1x4x1xf32> to vector<4x1xf32>
      %46 = vector.shape_cast %43 : vector<4x1xf32> to vector<1x4x1xf32>
      tpu.vector_store %arg7[%c0_29, %c0_30, %c0_31], %46 {strides = array<i32>} : memref<1x4x1xf32, #tpu.memory_space<vmem>>, vector<1x4x1xf32>,
    } else {
    }
    %c0_3 = arith.constant 0 : index
    %c0_4 = arith.constant 0 : index
    %c0_5 = arith.constant 0 : index
    %7 = vector.load %arg5[%c0_3, %c0_4, %c0_5] : memref<1x4x1xf32, #tpu.memory_space<vmem>>, vector<1x4x1xf32>
    %8 = vector.shape_cast %7 : vector<1x4x1xf32> to vector<4x1xf32>
    %9 = vector.broadcast %8 : vector<4x1xf32> to vector<4x256xf32>
    %10 = arith.subf %1, %9 : vector<4x256xf32>
    %c0_6 = arith.constant 0 : index
    %c0_7 = arith.constant 0 : index
    %c0_8 = arith.constant 0 : index
    %11 = vector.load %arg6[%c0_6, %c0_7, %c0_8] : memref<1x4x1xf32, #tpu.memory_space<vmem>>, vector<1x4x1xf32>
    %12 = vector.shape_cast %11 : vector<1x4x1xf32> to vector<4x1xf32>
    %cst = arith.constant dense<0.000000e+00> : vector<4xf32>
    %13 = vector.multi_reduction <add>, %10, %cst [1] : vector<4x256xf32> to vector<4xf32>
    %14 = vector.shape_cast %13 : vector<4xf32> to vector<4x1xf32>
    %15 = vector.broadcast %3 : f32 to vector<4x1xf32>
    %16 = arith.mulf %15, %14 : vector<4x1xf32>
    %17 = arith.addf %12, %16 : vector<4x1xf32>
    %c0_9 = arith.constant 0 : index
    %c0_10 = arith.constant 0 : index
    %c0_11 = arith.constant 0 : index
    %18 = vector.load %arg6[%c0_9, %c0_10, %c0_11] : memref<1x4x1xf32, #tpu.memory_space<vmem>>, vector<1x4x1xf32>
    %19 = vector.shape_cast %18 : vector<1x4x1xf32> to vector<4x1xf32>
    %20 = vector.shape_cast %17 : vector<4x1xf32> to vector<1x4x1xf32>
    tpu.vector_store %arg6[%c0_9, %c0_10, %c0_11], %20 {strides = array<i32>} : memref<1x4x1xf32, #tpu.memory_space<vmem>>, vector<1x4x1xf32>,
    %c0_12 = arith.constant 0 : index
    %c0_13 = arith.constant 0 : index
    %c0_14 = arith.constant 0 : index
    %21 = vector.load %arg7[%c0_12, %c0_13, %c0_14] : memref<1x4x1xf32, #tpu.memory_space<vmem>>, vector<1x4x1xf32>
    %22 = vector.shape_cast %21 : vector<1x4x1xf32> to vector<4x1xf32>
    %23 = arith.mulf %10, %10 : vector<4x256xf32>
    %cst_15 = arith.constant dense<0.000000e+00> : vector<4xf32>
    %24 = vector.multi_reduction <add>, %23, %cst_15 [1] : vector<4x256xf32> to vector<4xf32>
    %25 = vector.shape_cast %24 : vector<4xf32> to vector<4x1xf32>
    %26 = vector.broadcast %3 : f32 to vector<4x1xf32>
    %27 = arith.mulf %26, %25 : vector<4x1xf32>
    %28 = arith.addf %22, %27 : vector<4x1xf32>
    %c0_16 = arith.constant 0 : index
    %c0_17 = arith.constant 0 : index
    %c0_18 = arith.constant 0 : index
    %29 = vector.load %arg7[%c0_16, %c0_17, %c0_18] : memref<1x4x1xf32, #tpu.memory_space<vmem>>, vector<1x4x1xf32>
    %30 = vector.shape_cast %29 : vector<1x4x1xf32> to vector<4x1xf32>
    %31 = vector.shape_cast %28 : vector<4x1xf32> to vector<1x4x1xf32>
    tpu.vector_store %arg7[%c0_16, %c0_17, %c0_18], %31 {strides = array<i32>} : memref<1x4x1xf32, #tpu.memory_space<vmem>>, vector<1x4x1xf32>,
    return
  }
  func.func @transform_0(%arg0: i32, %arg1: i32, %arg2: i32) -> (i32, i32, i32) {
    %c0_i32 = arith.constant 0 : i32
    return %arg2, %arg0, %arg1 : i32, i32, i32
  }
  func.func @transform_1(%arg0: i32, %arg1: i32, %arg2: i32) -> i32 {
    %c0_i32 = arith.constant 0 : i32
    %c0_i32_0 = arith.constant 0 : i32
    return %c0_i32 : i32
  }
  func.func @transform_2(%arg0: i32, %arg1: i32, %arg2: i32) -> (i32, i32, i32) {
    %c0_i32 = arith.constant 0 : i32
    %c0_i32_0 = arith.constant 0 : i32
    return %arg1, %arg0, %c0_i32 : i32, i32, i32
  }
  func.func @transform_3(%arg0: i32, %arg1: i32, %arg2: i32) -> (i32, i32, i32) {
    %c0_i32 = arith.constant 0 : i32
    %c0_i32_0 = arith.constant 0 : i32
    return %arg1, %arg0, %c0_i32 : i32, i32, i32
  }
  func.func @transform_4(%arg0: i32, %arg1: i32, %arg2: i32) -> (i32, i32, i32) {
    %c0_i32 = arith.constant 0 : i32
    %c0_i32_0 = arith.constant 0 : i32
    return %arg1, %arg0, %c0_i32 : i32, i32, i32
  }
}

</mosaic_0001>

<bundles_post_ra>
// kernel: tpu_custom_call.1
= control target key start
LH: loop header
LB: loop body
LE: loop exit
PB: predicated region body
PF: predicated region fallthrough
CT: control target
= control target key end

     0   :  { %10 = vsyncpa [#allocation3], 0  ;;  %s904_s0 = inlined_call_operand.hbm [shape: f32[2,4,256], index: 0, kind: input, shape index: {}]   ;;  %s905_s1 = inlined_call_operand.hbm [shape: f32[2], index: 1, kind: input, shape index: {}]   ;;  %s906_s2 = inlined_call_operand.vmem [shape: f32[1,4,1], index: 2, kind: output, shape index: {0}]   ;;  %s907_s3 = inlined_call_operand.vmem [shape: f32[1,4,1], index: 3, kind: output, shape index: {1}]   ;;  %s908_s4 = inlined_call_operand.vmem [shape: f32[1,4,1], index: 4, kind: output, shape index: {2}]  }
   0x1   :  { %12 = vsyncpa [#allocation3 + $0x1], 0 }
   0x2   :  { %13 = vsyncpa [#allocation4], 0  ;;  %s775_s15 = smov 0   ;;  %s777_s16 = smov 0  }
   0x3   :  { %s779_s17 = smov 0   ;;  %s781_s18 = smov 0  }
   0x4   :  { %s783_s19 = smov 0   ;;  %s785_s20 = smov 0  }
   0x5 LB: > { %s554_s21 = sadd.s32 4294967295, %s743_s20   ;;  %p62_p0 = scmp.ne.s32.totalorder %s727_s16, %s723_s15  ;;  %s743_s20 = sphi %s785_s20, %s19_s20   ;;  %s739_s19 = sphi %s783_s19, %s916_s19   ;;  %s735_s18 = sphi %s781_s18, %s915_s18   ;;  %s731_s17 = sphi %s779_s17, %s914_s17   ;;  %s727_s16 = sphi %s777_s16, %s913_s16   ;;  %s723_s15 = sphi %s775_s15, %s912_s15  }
   0x6   : > { %p805_p1 = scmp.eq.s32.totalorder %s554_s21, 0  ;;  %p555_p2 = scmp.ge.s32.totalorder %s743_s20, 1 }
   0x7   : > { %p178_p3 = scmp.lt.s32.totalorder %s743_s20, 3  ;;  %s190_s26 = sshll.u32 %s905_s1, 4  ;;  %s191_s26 = int_to_ptr.hbm [resolvable:$true] %s190_s26 }
   0x8   : > { %p813_p4 = por %p805_p1, %p62_p0  ;;  %s31_s28 = sadd.s32 1, %s739_s19 }
   0x9   : > { %p820_p5 = pnand %p555_p2, %p178_p3  ;;  %p32_p8 = scmp.ge.s32.totalorder %s31_s28, 2 }
   0xa   : > { %s745_s29 = smov [#allocation5]   ;;  %s49_s30 = sadd.s32 1, %s731_s17 }
   0xb   : > { %p577_p6 = pneg %p820_p5  ;;  %s918_s28 = smov (%p32_p8, %s31_s28), 0 }
   0xc   : > { %p56_p9 = scmp.ne.s32.totalorder %s731_s17, %s727_s16  ;;  %s42_s5 = ssub.s32 %s739_s19, %s918_s28 }
   0xd   : > { %p578_p7 = pnand %p577_p6, %p805_p1  ;;  %p57_p10 = scmp.eq.s32.totalorder %s743_s20, 0 }
   0xe   : > { %p47_p11 = scmp.eq.s32.totalorder %s42_s5, 0  ;;  %p586_p12 = scmp.lt.s32.totalorder %s743_s20, 2 }
   0xf   : > { %580 = dma.hbm_to_smem (!%p578_p7), %s191_s26, 16, %s745_s29, [#allocation4]  }
  0x10   : > { %s201_s6 = sand.u32 1, %s731_s17   ;;  %s570_s7 = sshll.u32 %s739_s19, 3 }
  0x11   : > { %s841_s8 = scalar_select %p47_p11, %s731_s17, %s49_s30  }
  0x12   : > { %p58_p13 = por %p57_p10, %p56_p9  ;;  %s558_s9 = sshll.u32 %s201_s6, 3 }
  0x13   : > { %s214_s12 = scalar_lea.hbm %s904_s0, %s570_s7  ;;  %s205_s14 = scalar_lea.vmem [#allocation2], %s558_s9 }
  0x14   : > { %s216_s13 = sshll.u32 %s214_s12, 4  ;;  %s218_s15 = sshll.u32 %s205_s14, 4  ;;  %s217_s13 = int_to_ptr.hbm [resolvable:$true] %s216_s13  ;;  %s219_s15 = int_to_ptr.vmem [resolvable:$true] %s218_s15 }
  0x15   : > { %p582_p0 = pnand %p586_p12, %p58_p13  ;;  %s202_s21 = scalar_lea.sflag [#allocation3], %s201_s6 }
  0x16   : > { %227 = sbr.rel (%p820_p5) target bundleno = 435 (0x1b3), region = 28  ;;  %s229_s24 = sand.u32 (!%p820_p5), 1, %s727_s16  }
  0x17   : > { %584 = dma.hbm_to_vmem [thread:$0]  (!%p582_p0), %s217_s13, 128, %s219_s15, %s202_s21  }
  0x18   : > { %s562_s25 = sshll.u32 (!%p820_p5), %s229_s24, 3  ;;  %s230_s26 = scalar_lea.sflag (!%p820_p5), [#allocation3], %s229_s24 }
  0x19   : > { %s233_s29 = scalar_lea.vmem (!%p820_p5), [#allocation2], %s562_s25 }
  0x1b   : > { %714 = dma.done.wait (%p813_p4), %s230_s26, 128  }
  0x1c   : > { %716 = vsyncadd (%p813_p4), %s230_s26, 4294967168 }
  0x1d   : > { %718 = dma.done.wait (%p805_p1), [#allocation4], 16  }
  0x1e   : > { %720 = vsyncadd (%p805_p1), [#allocation4], 4294967280 }
  0x1f   : > { %244 = sfence }
  0x20   : > { %v303_v0 = vld [vmem:[%s233_s29] sm:$0xff]  ;;  %s858_s27 = sld [smem:[#allocation5 + %s735_s18]]  ;;  %p564_p2 = scmp.ne.s32.totalorder %s735_s18, 0 }
  0x22   : > { %308 = sbr.rel (%p564_p2) target bundleno = 169 (0xa9), region = 40 }
  0x27   : > { %310 = vst [vmem:[#allocation1] ss:$2 sm:$0xff] %v303_v0  ;;  %vm315_vm0 = vcmask 1043456   ;;  %vm329_vm1 = vcmask 3072   ;;  %v746_v6 = vmov 0.0   ;;  %v747_v7 = vmov 256.0  }
  0x28   : > { %331 = vst.msk [vmem:[%s907_s3] sm:$0xf] %vm329_vm1, %v746_v6  ;;  %641 = vrcp.f32 %v747_v7 }
  0x29   : > { %332 = vst.msk [vmem:[%s908_s4] sm:$0xf] %vm329_vm1, %v746_v6 }
  0x2e   : > { %v311_v1 = vld.sshfl [vmem:[#allocation1] sm:$0xff pattern:$0x75316420]  ;;  %v312_v2 = vld.sshfl [vmem:[#allocation1 + $0x8] sm:$0xff pattern:$0x75316420]  ;;  %v642_v8 = vpop.eup %641 }
  0x2f   : > { %v316_v3 = vsel %vm315_vm0, %v311_v1, 0.0  ;;  %v317_v4 = vsel %vm315_vm0, %v312_v2, 0.0  ;;  %v322_v9 = vmul.f32 256.0, %v642_v8  ;;  %vm326_vm2 = vweird.f32 %v642_v8 }
  0x30   : > { %v318_v5 = vadd.f32 %v317_v4, %v316_v3 }
  0x31   : > { %v323_v10 = vsub.f32 1.0, %v322_v9 }
  0x32   : > { %319 = vadd.xlane.f32.xlu0 %v318_v5 }
  0x33   : > { %v324_v11 = vmul.f32 %v642_v8, %v323_v10 }
  0x35   : > { %v325_v12 = vadd.f32 %v642_v8, %v324_v11 }
  0x37   : > { %v327_v13 = vsel %vm326_vm2, %v642_v8, %v325_v12 }
  0xa5   : > { %v320_v14 = vpop.xlane.xlu0 %319 }
  0xa6   : > { %v328_v15 = vmul.f32 %v327_v13, %v320_v14 }
  0xa8   : > { %330 = vst.msk [vmem:[%s906_s2] sm:$0xf] %vm329_vm1, %v328_v15 }
  0xa9 PF: > { %v748_v17 = vmov 0   ;;  %v749_v18 = vmov 839922192   ;;  %vm351_vm3 = vcmask 1043456   ;;  %v357_v35 = vstv %s858_s27  ;;  %v344_v36 = vld [vmem:[%s907_s3] sm:$0xf] }
  0xaa   : > { %643 = vset.pattern.permute.xlu0 %v748_v17  ;;  %v339_v19 = vunpack.c.l.s4 %v749_v18  ;;  %vm360_vm4 = vcmask 3072   ;;  %v362_v40 = vld [vmem:[%s908_s4] sm:$0xf] }
  0xac   : > { %v340_v20 = vunpack.c.0.s8 %v339_v19 }
  0xaf   : > { %v333_v16 = vld [vmem:[%s906_s2] sm:$0xf] }
  0xb0   : > { %336 = vperm.xlu0 %643, %v333_v16  }
 0x122   : > { %v337_v21 = vpop.permute.xlu0 %336 }
 0x123   : > { %v341_v22 = vperm.slane %v337_v21, %v340_v20 }
 0x125   : > { %v343_v23 = vsub.f32 %v303_v0, %v341_v22 }
 0x127   : > { %346 = vst [vmem:[#allocation1] ss:$2 sm:$0xff] %v343_v23  ;;  %v363_v24 = vmul.f32 %v343_v23, %v343_v23 }
 0x12e   : > { %v347_v25 = vld.sshfl [vmem:[#allocation1] sm:$0xff pattern:$0x75316420]  ;;  %v348_v26 = vld.sshfl [vmem:[#allocation1 + $0x8] sm:$0xff pattern:$0x75316420] }
 0x12f   : > { %v352_v27 = vsel %vm351_vm3, %v347_v25, 0.0  ;;  %v353_v28 = vsel %vm351_vm3, %v348_v26, 0.0  ;;  %365 = vst [vmem:[#allocation1] ss:$2 sm:$0xff] %v363_v24 }
 0x130   : > { %v354_v29 = vadd.f32 %v353_v28, %v352_v27 }
 0x132   : > { %355 = vadd.xlane.f32.xlu0 %v354_v29 }
 0x136   : > { %v366_v30 = vld.sshfl [vmem:[#allocation1] sm:$0xff pattern:$0x75316420]  ;;  %v367_v31 = vld.sshfl [vmem:[#allocation1 + $0x8] sm:$0xff pattern:$0x75316420] }
 0x137   : > { %v370_v32 = vsel %vm351_vm3, %v366_v30, 0.0  ;;  %v371_v33 = vsel %vm351_vm3, %v367_v31, 0.0 }
 0x138   : > { %v372_v34 = vadd.f32 %v371_v33, %v370_v32 }
 0x13a   : > { %373 = vadd.xlane.f32.xlu1 %v372_v34 }
 0x1a5   : > { %v356_v37 = vpop.xlane.xlu0 %355 }
 0x1a6   : > { %v358_v38 = vmul.f32 %v357_v35, %v356_v37 }
 0x1a8   : > { %v359_v39 = vadd.f32 %v358_v38, %v344_v36 }
 0x1aa   : > { %361 = vst.msk [vmem:[%s907_s3] sm:$0xf] %vm360_vm4, %v359_v39 }
 0x1ad   : > { %v374_v41 = vpop.xlane.xlu1 %373 }
 0x1ae   : > { %v375_v42 = vmul.f32 %v374_v41, %v357_v35 }
 0x1b0   : > { %v376_v43 = vadd.f32 %v375_v42, %v362_v40 }
 0x1b2   : > { %377 = vst.msk [vmem:[%s908_s4] sm:$0xf] %vm360_vm4, %v376_v43 }
 0x1b3 PF: > { %s19_s20 = sadd.s32 1, %s743_s20   ;;  %s912_s15 = smov %s727_s16 }
 0x1b4   : > { %p16_p1 = scmp.ge.s32.totalorder %s19_s20, 4   ;;  %s913_s16 = smov %s731_s17 }
 0x1b5   : > { %s914_s17 = smov %s841_s8  ;;  %s915_s18 = smov %s739_s19 }
 0x1b6   : > { %s916_s19 = smov %s918_s28  ;;  %18 = sbr.rel (!%p16_p1) target bundleno = 5 (0x5), region = 101 }
 0x1bb   :  { %443 = vsyncpa [#allocation3], 1 }
 0x1bc   :  { %445 = vsyncpa [#allocation3 + $0x1], 1 }
 0x1bd   :  { %446 = vsyncpa [#allocation4], 1 }
 0x1be   :  { %448 = vsyncpa [#allocation4 + $0x1], 1 }

</bundles_post_ra>
